<compile_context>
chip_gen: v5e
topology: v5e:2x2
jax: 0.10.0
libtpu: 0.0.40
codegen_flags: <defaults>
</compile_context>

<pallas_src>
import functools

import jax
import jax.numpy as jnp
from jax import lax
from jax.experimental import pallas as pl
from jax.experimental.pallas import tpu as pltpu

LANES = 128
SUB_ROWS = 512                        # in-kernel chunk: ~256 KiB f32 working set
TARGET_BLOCK_BYTES = 4 * 1024 * 1024  # per-input HBM tile per grid step
ONE_SHOT_ROWS = 1024                  # small inputs: single full-array block
VMEM_LIMIT_BYTES = 32 * 1024 * 1024   # 2 inputs x 2 buffers x 4 MiB + headroom


def _num_tensorcores():
    """TensorCores per device: 2 on v7x-class chips, else 1 (always safe)."""
    try:
        kind = jax.devices()[0].device_kind.lower()
    except Exception:
        return 1
    # v7x exposes 2 TensorCores per device; v2-v6 devices behave as a single
    # core for Pallas grids, so the safe/neutral default is 1.
    return 2 if "7" in kind else 1


def _charbonnier_kernel(x_ref, y_ref, o_ref, acc_ref, *,
                        eps, total_rows, sub_rows, need_mask):
    c = pl.program_id(0)               # TensorCore shard (CORE_PARALLEL axis)
    i = pl.program_id(1)               # sequential reduction step within shard
    inner = pl.num_programs(1)
    block_rows = x_ref.shape[0]
    n_sub = block_rows // sub_rows     # wrapper guarantees exact divisibility
    grouped = (sub_rows % 8 == 0)      # (8,128) sublane/lane-parallel partials

    @pl.when(i == 0)
    def _init():
        acc_ref[...] = jnp.zeros_like(acc_ref)

    eps2 = jnp.float32(eps) * jnp.float32(eps)
    # Global row offset of this (unclamped) block; overhang / partial rows are
    # masked against total_rows below.
    block_row0 = (c * inner + i) * block_rows

    def chunk_partial(r0, masked):
        """Partial Charbonnier sums over block rows [r0, r0 + sub_rows)."""
        xs = x_ref[pl.ds(r0, sub_rows), :].astype(jnp.float32)
        ys = y_ref[pl.ds(r0, sub_rows), :].astype(jnp.float32)
        d = xs - ys
        v = jnp.sqrt(d * d + eps2)                   # sqrt lowers to the EUP slot
        if masked:
            # Row-granular mask (element count seen by the kernel is always a
            # multiple of 128): a single (sub_rows, 1) iota, broadcast compare.
            rid = (block_row0 + r0 +
                   lax.broadcasted_iota(jnp.int32, (sub_rows, 1), 0))
            v = jnp.where(rid < total_rows, v, jnp.float32(0.0))
        if grouped:
            # (sub_rows,128)->(sub_rows//8,8,128) splits whole (8,128) tiles
            # (a free view); the axis-0 sum is plain vreg adds on the VALU, so
            # no XLU push per step - the cross-sublane reduce is deferred.
            return v.reshape(sub_rows // 8, 8, LANES).sum(axis=0)
        return jnp.sum(v, axis=0, keepdims=True)     # tiny non-8-aligned block

    def accumulate(masked):
        if n_sub == 1:
            acc_ref[...] += chunk_partial(0, masked)
        else:
            def body(t, carry):
                r0 = pl.multiple_of(t * sub_rows, 8)
                return carry + chunk_partial(r0, masked)
            acc_ref[...] += lax.fori_loop(
                0, n_sub, body, jnp.zeros(acc_ref.shape, jnp.float32))

    if need_mask:
        is_full = block_row0 + block_rows <= total_rows

        @pl.when(is_full)
        def _bulk():
            accumulate(masked=False)

        @pl.when(jnp.logical_not(is_full))
        def _boundary():
            accumulate(masked=True)
    else:
        accumulate(masked=False)

    @pl.when(i == inner - 1)
    def _epilogue():
        o_ref[0] = acc_ref[...]


def charbonnier_loss(x, y, eps=1e-6, target_block_bytes=TARGET_BLOCK_BYTES):
    """Pallas TPU implementation of Loss.forward(x, y) = sum(sqrt((x-y)^2 + eps^2))."""
    assert x.shape == y.shape, "x and y must have the same shape"
    n = x.size
    assert 0 < n < 2**31, "element count must fit in int32"

    eps2 = jnp.float32(eps) * jnp.float32(eps)
    xf = x.reshape(-1)
    yf = y.reshape(-1)

    rows = n // LANES            # lane-aligned prefix handled by the kernel
    n_main = rows * LANES
    tail = n - n_main            # < 128 elements, handled by plain jnp below

    total = jnp.float32(0.0)

    if rows > 0:
        x2 = xf[:n_main].reshape(rows, LANES)
        y2 = yf[:n_main].reshape(rows, LANES)

        itemsize = max(x.dtype.itemsize, y.dtype.itemsize)
        if rows <= ONE_SHOT_ROWS:
            block_rows = rows    # full-dim block: always legal, no masking
            sub_rows = rows
        else:
            sub_rows = SUB_ROWS
            big_rows = max(
                sub_rows,
                (target_block_bytes // (LANES * itemsize)) // sub_rows * sub_rows)
            block_rows = min(big_rows, rows // sub_rows * sub_rows)

        acc_rows = 8 if sub_rows % 8 == 0 else 1
        total_blocks = pl.cdiv(rows, block_rows)
        shards = min(_num_tensorcores(), total_blocks)
        inner = pl.cdiv(total_blocks, shards)
        need_mask = (rows % block_rows != 0) or (shards * inner != total_blocks)

        def in_map(c, i):
            # Clamp shard-overhang block indices onto the last real block;
            # their contribution is masked to zero inside the kernel.
            return (jnp.minimum(c * inner + i, total_blocks - 1), 0)

        kernel = functools.partial(
            _charbonnier_kernel, eps=eps, total_rows=rows,
            sub_rows=sub_rows, need_mask=need_mask)

        if shards > 1:
            dim_sem = (pltpu.CORE_PARALLEL, pltpu.ARBITRARY)
        else:
            dim_sem = (pltpu.ARBITRARY, pltpu.ARBITRARY)

        in_bytes = n_main * (x.dtype.itemsize + y.dtype.itemsize)
        cost = pl.CostEstimate(
            flops=4 * n_main,
            transcendentals=n_main,
            bytes_accessed=in_bytes + shards * acc_rows * LANES * 4)

        partials = pl.pallas_call(
            kernel,
            out_shape=jax.ShapeDtypeStruct((shards, acc_rows, LANES), jnp.float32),
            grid_spec=pltpu.PrefetchScalarGridSpec(
                num_scalar_prefetch=0,
                grid=(shards, inner),
                in_specs=[
                    pl.BlockSpec((block_rows, LANES), in_map),
                    pl.BlockSpec((block_rows, LANES), in_map),
                ],
                out_specs=pl.BlockSpec((1, acc_rows, LANES),
                                       lambda c, i: (c, 0, 0)),
                scratch_shapes=[pltpu.VMEM((acc_rows, LANES), jnp.float32)],
            ),
            compiler_params=pltpu.CompilerParams(
                dimension_semantics=dim_sem,
                vmem_limit_bytes=VMEM_LIMIT_BYTES,
            ),
            cost_estimate=cost,
        )(x2, y2)

        # Tiny final reduce over shards x 8 x 128 lane/sublane partials.
        total = total + jnp.sum(partials)

    if tail:
        dt = xf[n_main:].astype(jnp.float32) - yf[n_main:].astype(jnp.float32)
        total = total + jnp.sum(jnp.sqrt(dt * dt + eps2))

    return total


def charbonnier_loss_ref(x, y, eps=1e-6):
    d = x.astype(jnp.float32) - y.astype(jnp.float32)
    return jnp.sum(jnp.sqrt(d * d + jnp.float32(eps) * jnp.float32(eps)))


if __name__ == "__main__":
    key = jax.random.PRNGKey(0)
    kx, ky, kx2, ky2, kx3, ky3 = jax.random.split(key, 6)

    # Small NCHW-like shape consistent with an image-restoration loss.
    x = jax.random.normal(kx, (2, 4, 16, 16), dtype=jnp.float32)
    y = jax.random.normal(ky, (2, 4, 16, 16), dtype=jnp.float32)
    loss = jax.block_until_ready(charbonnier_loss(x, y))
    ref = charbonnier_loss_ref(x, y)
    assert jnp.allclose(loss, ref, rtol=1e-4, atol=1e-2), (loss, ref)

    # Ragged shape exercising the lane-tail path (no jnp.pad copy).
    xr = jax.random.normal(kx2, (2, 3, 15, 17), dtype=jnp.float32)
    yr = jax.random.normal(ky2, (2, 3, 15, 17), dtype=jnp.float32)
    loss_r = jax.block_until_ready(charbonnier_loss(xr, yr))
    ref_r = charbonnier_loss_ref(xr, yr)
    assert jnp.allclose(loss_r, ref_r, rtol=1e-4, atol=1e-2), (loss_r, ref_r)

    # Multi-block shape exercising the chunked fori_loop + row-masked boundary.
    xm = jax.random.normal(kx3, (2, 4, 120, 160), dtype=jnp.float32)
    ym = jax.random.normal(ky3, (2, 4, 120, 160), dtype=jnp.float32)
    loss_m = jax.block_until_ready(charbonnier_loss(xm, ym))
    ref_m = charbonnier_loss_ref(xm, ym)
    assert jnp.allclose(loss_m, ref_m, rtol=1e-4, atol=1e-2), (loss_m, ref_m)

    print("KERNEL_OK")
</pallas_src>

<mosaic_0001>
module attributes {stable_mosaic.version = 11 : i64} {
  func.func @_charbonnier_kernel(%arg0: i32, %arg1: i32, %arg2: memref<16x128xf32, #tpu.memory_space<vmem>>, %arg3: memref<16x128xf32, #tpu.memory_space<vmem>>, %arg4: memref<1x8x128xf32, #tpu.memory_space<vmem>>, %arg5: memref<8x128xf32, #tpu.memory_space<vmem>>) attributes {dimension_semantics = [#tpu.dimension_semantics<arbitrary>, #tpu.dimension_semantics<arbitrary>], iteration_bounds = array<i64: 1, 1>, scalar_prefetch = 0 : i64, scratch_operands = 1 : i64, tpu.core_type = #tpu.core_type<tc>, window_params = [{transform_indices = @transform_0, window_bounds = array<i64: 16, 128>}, {transform_indices = @transform_1, window_bounds = array<i64: 16, 128>}, {transform_indices = @transform_2, window_bounds = array<i64: 1, 8, 128>}]} {
    %c0_i32 = arith.constant 0 : i32
    %0 = arith.cmpi eq, %arg1, %c0_i32 : i32
    %1 = arith.extui %0 : i1 to i32
    %c0_i32_0 = arith.constant 0 : i32
    %2 = arith.cmpi ne, %1, %c0_i32_0 : i32
    scf.if %2 {
      %cst_12 = arith.constant 0.000000e+00 : f32
      %19 = vector.broadcast %cst_12 : f32 to vector<8x128xf32>
      %c0_13 = arith.constant 0 : index
      %c0_14 = arith.constant 0 : index
      %20 = vector.load %arg5[%c0_13, %c0_14] : memref<8x128xf32, #tpu.memory_space<vmem>>, vector<8x128xf32>
      tpu.vector_store %arg5[%c0_13, %c0_14], %19 {strides = array<i32>} : memref<8x128xf32, #tpu.memory_space<vmem>>, vector<8x128xf32>,
    } else {
    }
    %cst = arith.constant 9.99999997E-7 : f32
    %cst_1 = arith.constant 9.99999997E-7 : f32
    %3 = arith.mulf %cst, %cst_1 : f32
    %c0 = arith.constant 0 : index
    %c0_2 = arith.constant 0 : index
    %4 = vector.load %arg5[%c0, %c0_2] : memref<8x128xf32, #tpu.memory_space<vmem>>, vector<8x128xf32>
    %c0_3 = arith.constant 0 : index
    %c0_4 = arith.constant 0 : index
    %5 = vector.load %arg2[%c0_3, %c0_4] : memref<16x128xf32, #tpu.memory_space<vmem>>, vector<16x128xf32>
    %c0_5 = arith.constant 0 : index
    %c0_6 = arith.constant 0 : index
    %6 = vector.load %arg3[%c0_5, %c0_6] : memref<16x128xf32, #tpu.memory_space<vmem>>, vector<16x128xf32>
    %7 = arith.subf %5, %6 : vector<16x128xf32>
    %8 = arith.mulf %7, %7 : vector<16x128xf32>
    %9 = vector.broadcast %3 : f32 to vector<16x128xf32>
    %10 = arith.addf %8, %9 : vector<16x128xf32>
    %11 = math.sqrt %10 : vector<16x128xf32>
    %12 = vector.shape_cast %11 : vector<16x128xf32> to vector<2x8x128xf32>
    %cst_7 = arith.constant dense<0.000000e+00> : vector<8x128xf32>
    %13 = vector.multi_reduction <add>, %12, %cst_7 [0] : vector<2x8x128xf32> to vector<8x128xf32>
    %14 = arith.addf %4, %13 : vector<8x128xf32>
    %c0_8 = arith.constant 0 : index
    %c0_9 = arith.constant 0 : index
    %15 = vector.load %arg5[%c0_8, %c0_9] : memref<8x128xf32, #tpu.memory_space<vmem>>, vector<8x128xf32>
    tpu.vector_store %arg5[%c0_8, %c0_9], %14 {strides = array<i32>} : memref<8x128xf32, #tpu.memory_space<vmem>>, vector<8x128xf32>,
    %c0_i32_10 = arith.constant 0 : i32
    %16 = arith.cmpi eq, %arg1, %c0_i32_10 : i32
    %17 = arith.extui %16 : i1 to i32
    %c0_i32_11 = arith.constant 0 : i32
    %18 = arith.cmpi ne, %17, %c0_i32_11 : i32
    scf.if %18 {
      %c0_12 = arith.constant 0 : index
      %c0_13 = arith.constant 0 : index
      %19 = vector.load %arg5[%c0_12, %c0_13] : memref<8x128xf32, #tpu.memory_space<vmem>>, vector<8x128xf32>
      %c0_14 = arith.constant 0 : index
      %c0_15 = arith.constant 0 : index
      %c0_16 = arith.constant 0 : index
      %20 = vector.load %arg4[%c0_14, %c0_15, %c0_16] : memref<1x8x128xf32, #tpu.memory_space<vmem>>, vector<1x8x128xf32>
      %21 = vector.shape_cast %20 : vector<1x8x128xf32> to vector<8x128xf32>
      %22 = vector.shape_cast %19 : vector<8x128xf32> to vector<1x8x128xf32>
      tpu.vector_store %arg4[%c0_14, %c0_15, %c0_16], %22 {strides = array<i32>} : memref<1x8x128xf32, #tpu.memory_space<vmem>>, vector<1x8x128xf32>,
    } else {
    }
    return
  }
  func.func @transform_0(%arg0: i32, %arg1: i32) -> (i32, i32) {
    %c1_i32 = arith.constant 1 : i32
    %0 = arith.muli %arg0, %c1_i32 : i32
    %1 = arith.addi %0, %arg1 : i32
    %c0_i32 = arith.constant 0 : i32
    %2 = arith.minsi %1, %c0_i32 : i32
    %c0_i32_0 = arith.constant 0 : i32
    %c0_i32_1 = arith.constant 0 : i32
    return %2, %c0_i32_0 : i32, i32
  }
  func.func @transform_1(%arg0: i32, %arg1: i32) -> (i32, i32) {
    %c1_i32 = arith.constant 1 : i32
    %0 = arith.muli %arg0, %c1_i32 : i32
    %1 = arith.addi %0, %arg1 : i32
    %c0_i32 = arith.constant 0 : i32
    %2 = arith.minsi %1, %c0_i32 : i32
    %c0_i32_0 = arith.constant 0 : i32
    %c0_i32_1 = arith.constant 0 : i32
    return %2, %c0_i32_0 : i32, i32
  }
  func.func @transform_2(%arg0: i32, %arg1: i32) -> (i32, i32, i32) {
    %c0_i32 = arith.constant 0 : i32
    %c0_i32_0 = arith.constant 0 : i32
    %c0_i32_1 = arith.constant 0 : i32
    return %arg0, %c0_i32, %c0_i32_0 : i32, i32, i32
  }
}

</mosaic_0001>

<bundles_post_ra>
// kernel: tpu_custom_call.1
= control target key start
LH: loop header
LB: loop body
LE: loop exit
PB: predicated region body
PF: predicated region fallthrough
CT: control target
= control target key end

     0   :  { %7 = vsyncpa [#allocation4], 0  ;;  %s250_s0 = inlined_call_operand.hbm [shape: f32[16,128], index: 0, kind: input, shape index: {}]   ;;  %s251_s1 = inlined_call_operand.hbm [shape: f32[16,128], index: 1, kind: input, shape index: {}]   ;;  %s252_s2 = inlined_call_operand.hbm [shape: f32[1,8,128], index: 2, kind: output, shape index: {}]  }
   0x1   :  { %8 = vsyncpa [#allocation7], 0 }
   0x2   :  { %9 = vsyncpa [#allocation5], 0  ;;  %s20_s11 = sshll.u32 %s250_s0, 4  ;;  %s221_s12 = smov [#allocation3]   ;;  %s21_s11 = int_to_ptr.hbm [resolvable:$true] %s20_s11 }
   0x3   :  { %s22_s13 = sshll.u32 %s221_s12, 4  ;;  %s39_s16 = sshll.u32 %s251_s1, 4  ;;  %s23_s13 = int_to_ptr.vmem [resolvable:$true] %s22_s13  ;;  %s40_s16 = int_to_ptr.hbm [resolvable:$true] %s39_s16 }
   0x4   :  { %s222_s17 = smov 128   ;;  %s223_s18 = smov 8  }
   0x5   :  { %28 = dma.hbm_to_vmem [thread:$0]  %s21_s11, 256, %s23_s13, [#allocation4], %s222_s17, %s222_s17, %s223_s18  }
   0x6   :  { %s224_s19 = smov [#allocation6]  }
   0x7   :  { %s41_s20 = sshll.u32 %s224_s19, 4  ;;  %s42_s20 = int_to_ptr.vmem [resolvable:$true] %s41_s20 }
   0x8   :  { %47 = dma.hbm_to_vmem [thread:$0]  %s40_s16, 256, %s42_s20, [#allocation7], %s222_s17, %s222_s17, %s223_s18  }
   0x9   :  { %215 = dma.done.wait [#allocation4], 256  }
   0xa   :  { %216 = vsyncadd [#allocation4], 4294967040 }
   0xb   :  { %217 = dma.done.wait [#allocation7], 256  }
   0xc   :  { %218 = vsyncadd [#allocation7], 4294967040  ;;  %v70_v0 = vld [vmem:[#allocation3] sm:$0xff]  ;;  %v71_v1 = vld [vmem:[#allocation3 + $0x8] sm:$0xff]  ;;  %s225_s0 = smov [#allocation8]   ;;  %s119_s23 = sshll.u32 %s252_s2, 4  ;;  %s120_s23 = int_to_ptr.hbm [resolvable:$true] %s119_s23 }
   0xd   :  { %v72_v2 = vld [vmem:[#allocation6] sm:$0xff]  ;;  %v73_v3 = vld [vmem:[#allocation6 + $0x8] sm:$0xff]  ;;  %s117_s1 = sshll.u32 %s225_s0, 4  ;;  %s118_s1 = int_to_ptr.vmem [resolvable:$true] %s117_s1 }
   0xe   :  { %v74_v4 = vsub.f32 %v70_v0, %v72_v2  ;;  %v75_v5 = vsub.f32 %v71_v1, %v73_v3 }
  0x10   :  { %v76_v6 = vmul.f32 %v74_v4, %v74_v4  ;;  %v77_v7 = vmul.f32 %v75_v5, %v75_v5 }
  0x12   :  { %v78_v8 = vadd.f32 1e-12, %v76_v6  ;;  %v79_v9 = vadd.f32 1e-12, %v77_v7 }
  0x14   :  { %139 = vrsqrt.f32 %v78_v8  ;;  %vm87_vm0 = vcmp.eq.f32.partialorder %v78_v8, inf  ;;  %v90_v21 = vand.u32 2147483648, %v78_v8  ;;  %vm89_vm1 = vcmp.eq.f32.partialorder %v78_v8, 0.0 }
  0x15   :  { %141 = vrsqrt.f32 %v79_v9  ;;  %vm99_vm2 = vcmp.eq.f32.partialorder %v79_v9, inf  ;;  %v102_v24 = vand.u32 2147483648, %v79_v9  ;;  %vm101_vm3 = vcmp.eq.f32.partialorder %v79_v9, 0.0 }
  0x1a   :  { %v140_v10 = vpop.eup %139 }
  0x1b   :  { %v142_v11 = vpop.eup %141  ;;  %v81_v12 = vmul.f32 %v140_v10, %v78_v8 }
  0x1c   :  { %v93_v13 = vmul.f32 %v142_v11, %v79_v9 }
  0x1d   :  { %v82_v14 = vmul.f32 %v140_v10, %v81_v12 }
  0x1e   :  { %v94_v15 = vmul.f32 %v142_v11, %v93_v13 }
  0x1f   :  { %v83_v16 = vmul.f32 0.5, %v82_v14 }
  0x20   :  { %v95_v17 = vmul.f32 0.5, %v94_v15 }
  0x21   :  { %v84_v18 = vsub.f32 1.5, %v83_v16 }
  0x22   :  { %v96_v19 = vsub.f32 1.5, %v95_v17 }
  0x23   :  { %v85_v20 = vmul.f32 %v140_v10, %v84_v18 }
  0x24   :  { %v97_v22 = vmul.f32 %v142_v11, %v96_v19 }
  0x25   :  { %v86_v23 = vmul.f32 %v85_v20, %v78_v8 }
  0x26   :  { %v98_v25 = vmul.f32 %v97_v22, %v79_v9 }
  0x27   :  { %v88_v26 = vsel %vm87_vm0, %v78_v8, %v86_v23 }
  0x28   :  { %v91_v27 = vsel %vm89_vm1, %v90_v21, %v88_v26  ;;  %v100_v28 = vsel %vm99_vm2, %v79_v9, %v98_v25 }
  0x29   :  { %v103_v29 = vsel %vm101_vm3, %v102_v24, %v100_v28 }
  0x2a   :  { %v104_v30 = vadd.f32 %v103_v29, %v91_v27 }
  0x2c   :  { %111 = vst [vmem:[#allocation8] sm:$0xff] %v104_v30 }
  0x2d   :  { %122 = dma.vmem_to_hbm [thread:$0]  %s118_s1, 128, %s120_s23, [#allocation5]  }
  0x2e   :  { %219 = dma.done.wait [#allocation5], 128  }
  0x2f   :  { %220 = vsyncadd [#allocation5], 4294967168 }
  0x30   :  { %127 = vsyncpa [#allocation4], 1 }
  0x31   :  { %128 = vsyncpa [#allocation7], 1 }
  0x32   :  { %129 = vsyncpa [#allocation5], 1 }

</bundles_post_ra>
